<compile_context>
chip_gen: v7x
topology: tpu7x:2x2x1
jax: 0.10.0
libtpu: 0.0.40
codegen_flags: <defaults>
</compile_context>

<pallas_src>
import functools
import math

import jax
import jax.numpy as jnp
from jax.experimental import pallas as pl
from jax.experimental.pallas import tpu as pltpu

_TWO_PI = 2.0 * math.pi
_INV_TWO_PI = 1.0 / _TWO_PI
_TWO_PI_HI = 6.28125                 # only 7 mantissa bits -> k * _TWO_PI_HI exact for k < 2^17
_TWO_PI_LO = _TWO_PI - _TWO_PI_HI    # small correction term


def _rope_table_kernel(pos_ref, inv_ref, cos_ref, sin_ref, *, half_compute):
    # pos_ref: (1, T, 1)  f32 position ids (pre-cast, trailing-dim broadcast layout)
    # inv_ref: (1, 1, Dk) f32 inverse frequencies (Dk = dim/2 if half_compute else dim)
    # cos_ref/sin_ref: (1, T, dim) outputs in x.dtype
    pos = pos_ref[...]
    inv = inv_ref[...]
    ang = pos * inv                                    # (1, T, Dk) broadcast multiply (VPU)

    # Cody-Waite range reduction to [-pi, pi]: keeps Mosaic's sin/cos accurate for
    # large angles (positions up to ~1e5 are reduced near-exactly in f32).
    k = jnp.floor(ang * _INV_TWO_PI + 0.5)
    r = (ang - k * _TWO_PI_HI) - k * _TWO_PI_LO

    c = jnp.cos(r).astype(cos_ref.dtype)               # EUP transcendentals, cast once at store
    s = jnp.sin(r).astype(sin_ref.dtype)

    if half_compute:
        # Second half of the lanes is an exact duplicate: compute once, store twice.
        h = c.shape[-1]
        cos_ref[:, :, 0:h] = c
        cos_ref[:, :, h:2 * h] = c
        sin_ref[:, :, 0:h] = s
        sin_ref[:, :, h:2 * h] = s
    else:
        cos_ref[...] = c
        sin_ref[...] = s


@functools.partial(jax.jit, static_argnames=("dim", "base", "tile_s"))
def gemma2_rotary_embedding(x, position_ids, *, dim, base=10000.0, tile_s=512):
    """Returns (cos, sin), each (B, S, dim) in x.dtype (matches torch Gemma2RotaryEmbedding)."""
    B, S = position_ids.shape
    out_dtype = x.dtype

    # Registered buffer of the torch module: inv_freq = 1 / base^(arange(0, dim, 2)/dim).
    inv_half = 1.0 / (base ** (jnp.arange(0, dim, 2, dtype=jnp.float32) / dim))   # (dim/2,)

    # Compute only the first half of the lanes when the half is itself lane-dense
    # (dim/2 a multiple of 128); otherwise pre-duplicate so emb = cat([freqs, freqs]).
    half_compute = (dim % 256 == 0)
    if half_compute:
        inv = inv_half.reshape(1, 1, dim // 2)
    else:
        inv = jnp.concatenate([inv_half, inv_half], axis=0).reshape(1, 1, dim)

    # Positions pre-cast to f32 and shaped (B, S, 1): S stays on sublanes (matches the
    # output layout), so the in-kernel multiply is a pure lane-axis broadcast.
    # NOTE: f32 positions are exact for position ids < 2^24.
    pos_f = position_ids.astype(jnp.float32).reshape(B, S, 1)

    t = S if S <= tile_s else tile_s
    grid = (B, pl.cdiv(S, t))

    kernel = functools.partial(_rope_table_kernel, half_compute=half_compute)
    cos, sin = pl.pallas_call(
        kernel,
        grid=grid,
        in_specs=[
            pl.BlockSpec((1, t, 1), lambda b, s: (b, s, 0)),               # position ids
            pl.BlockSpec((1, 1, inv.shape[-1]), lambda b, s: (0, 0, 0)),   # inv_freq (constant)
        ],
        out_specs=(
            pl.BlockSpec((1, t, dim), lambda b, s: (b, s, 0)),
            pl.BlockSpec((1, t, dim), lambda b, s: (b, s, 0)),
        ),
        out_shape=(
            jax.ShapeDtypeStruct((B, S, dim), out_dtype),
            jax.ShapeDtypeStruct((B, S, dim), out_dtype),
        ),
        compiler_params=pltpu.CompilerParams(
            dimension_semantics=("parallel", "parallel")),
    )(pos_f, inv)
    return cos, sin


if __name__ == "__main__":
    B, S, DIM = 2, 8, 256          # Gemma2-style head_dim=256 (exercises the half-compute path)
    BASE = 10000.0

    key = jax.random.PRNGKey(0)
    kx, kp = jax.random.split(key)
    x = jax.random.normal(kx, (B, S, DIM), jnp.float32)                      # only dtype matters
    position_ids = jax.random.randint(kp, (B, S), 0, 2048, dtype=jnp.int32)

    cos, sin = gemma2_rotary_embedding(x, position_ids, dim=DIM, base=BASE)
    cos = jax.block_until_ready(cos)
    sin = jax.block_until_ready(sin)

    # Pure-JAX reference mirroring torch's Gemma2RotaryEmbedding.forward exactly.
    def reference(dim):
        invf = 1.0 / (BASE ** (jnp.arange(0, dim, 2, dtype=jnp.float32) / dim))
        freqs = position_ids.astype(jnp.float32)[:, :, None] * invf[None, None, :]
        emb = jnp.concatenate([freqs, freqs], axis=-1)
        return jnp.cos(emb).astype(x.dtype), jnp.sin(emb).astype(x.dtype)

    ref_cos, ref_sin = reference(DIM)
    assert cos.shape == (B, S, DIM) and sin.shape == (B, S, DIM)
    assert cos.dtype == x.dtype and sin.dtype == x.dtype
    assert bool(jnp.all(jnp.isfinite(cos))) and bool(jnp.all(jnp.isfinite(sin)))
    # Angles reach O(2000) rad; with f32 arguments any two correctly range-reduced
    # sin/cos implementations agree only to ~1e-5..1e-4, so compare at 1e-3.
    assert bool(jnp.allclose(cos, ref_cos, atol=1e-3, rtol=0.0))
    assert bool(jnp.allclose(sin, ref_sin, atol=1e-3, rtol=0.0))
    # Reference-free consistency: cos^2 + sin^2 == 1.
    unit = cos.astype(jnp.float32) ** 2 + sin.astype(jnp.float32) ** 2
    assert bool(jnp.allclose(unit, jnp.ones_like(unit), atol=1e-4))

    # Also exercise the full-width path (dim=128, no lane duplication).
    cos128, sin128 = gemma2_rotary_embedding(x[..., :128], position_ids, dim=128, base=BASE)
    cos128 = jax.block_until_ready(cos128)
    sin128 = jax.block_until_ready(sin128)
    ref_cos128, ref_sin128 = reference(128)
    assert bool(jnp.allclose(cos128, ref_cos128, atol=1e-3, rtol=0.0))
    assert bool(jnp.allclose(sin128, ref_sin128, atol=1e-3, rtol=0.0))

    print("KERNEL_OK")
</pallas_src>

<mosaic_0001>
module attributes {stable_mosaic.version = 11 : i64} {
  func.func @_rope_table_kernel(%arg0: i32, %arg1: i32, %arg2: memref<1x8x1xf32, #tpu.memory_space<vmem>>, %arg3: memref<1x1x128xf32, #tpu.memory_space<vmem>>, %arg4: memref<1x8x256xf32, #tpu.memory_space<vmem>>, %arg5: memref<1x8x256xf32, #tpu.memory_space<vmem>>) attributes {dimension_semantics = [#tpu.dimension_semantics<parallel>, #tpu.dimension_semantics<parallel>], iteration_bounds = array<i64: 2, 1>, scalar_prefetch = 0 : i64, scratch_operands = 0 : i64, tpu.core_type = #tpu.core_type<tc>, window_params = [{transform_indices = @transform_0, window_bounds = array<i64: 1, 8, 1>}, {pipeline_mode = #tpu.pipeline_mode<synchronous>, transform_indices = @transform_1, window_bounds = array<i64: 1, 1, 128>}, {transform_indices = @transform_2, window_bounds = array<i64: 1, 8, 256>}, {transform_indices = @transform_3, window_bounds = array<i64: 1, 8, 256>}]} {
    %c0 = arith.constant 0 : index
    %c0_0 = arith.constant 0 : index
    %c0_1 = arith.constant 0 : index
    %0 = vector.load %arg2[%c0, %c0_0, %c0_1] : memref<1x8x1xf32, #tpu.memory_space<vmem>>, vector<1x8x1xf32>
    %c0_2 = arith.constant 0 : index
    %c0_3 = arith.constant 0 : index
    %c0_4 = arith.constant 0 : index
    %1 = vector.load %arg3[%c0_2, %c0_3, %c0_4] : memref<1x1x128xf32, #tpu.memory_space<vmem>>, vector<1x1x128xf32>
    %2 = vector.broadcast %0 : vector<1x8x1xf32> to vector<1x8x128xf32>
    %3 = vector.broadcast %1 : vector<1x1x128xf32> to vector<1x8x128xf32>
    %4 = arith.mulf %2, %3 : vector<1x8x128xf32>
    %cst = arith.constant 0.159154937 : f32
    %5 = vector.broadcast %cst : f32 to vector<1x8x128xf32>
    %6 = arith.mulf %4, %5 : vector<1x8x128xf32>
    %cst_5 = arith.constant 5.000000e-01 : f32
    %7 = vector.broadcast %cst_5 : f32 to vector<1x8x128xf32>
    %8 = arith.addf %6, %7 : vector<1x8x128xf32>
    %9 = math.floor %8 : vector<1x8x128xf32>
    %cst_6 = arith.constant 6.281250e+00 : f32
    %10 = vector.broadcast %cst_6 : f32 to vector<1x8x128xf32>
    %11 = arith.mulf %9, %10 : vector<1x8x128xf32>
    %12 = arith.subf %4, %11 : vector<1x8x128xf32>
    %cst_7 = arith.constant 0.00193530717 : f32
    %13 = vector.broadcast %cst_7 : f32 to vector<1x8x128xf32>
    %14 = arith.mulf %9, %13 : vector<1x8x128xf32>
    %15 = arith.subf %12, %14 : vector<1x8x128xf32>
    %16 = math.cos %15 : vector<1x8x128xf32>
    %17 = math.sin %15 : vector<1x8x128xf32>
    %c0_8 = arith.constant 0 : index
    %c0_9 = arith.constant 0 : index
    %c0_10 = arith.constant 0 : index
    %18 = vector.load %arg4[%c0_8, %c0_9, %c0_10] : memref<1x8x256xf32, #tpu.memory_space<vmem>>, vector<1x8x128xf32>
    tpu.vector_store %arg4[%c0_8, %c0_9, %c0_10], %16 {strides = array<i32>} : memref<1x8x256xf32, #tpu.memory_space<vmem>>, vector<1x8x128xf32>,
    %c0_11 = arith.constant 0 : index
    %c0_12 = arith.constant 0 : index
    %c128 = arith.constant 128 : index
    %19 = vector.load %arg4[%c0_11, %c0_12, %c128] : memref<1x8x256xf32, #tpu.memory_space<vmem>>, vector<1x8x128xf32>
    tpu.vector_store %arg4[%c0_11, %c0_12, %c128], %16 {strides = array<i32>} : memref<1x8x256xf32, #tpu.memory_space<vmem>>, vector<1x8x128xf32>,
    %c0_13 = arith.constant 0 : index
    %c0_14 = arith.constant 0 : index
    %c0_15 = arith.constant 0 : index
    %20 = vector.load %arg5[%c0_13, %c0_14, %c0_15] : memref<1x8x256xf32, #tpu.memory_space<vmem>>, vector<1x8x128xf32>
    tpu.vector_store %arg5[%c0_13, %c0_14, %c0_15], %17 {strides = array<i32>} : memref<1x8x256xf32, #tpu.memory_space<vmem>>, vector<1x8x128xf32>,
    %c0_16 = arith.constant 0 : index
    %c0_17 = arith.constant 0 : index
    %c128_18 = arith.constant 128 : index
    %21 = vector.load %arg5[%c0_16, %c0_17, %c128_18] : memref<1x8x256xf32, #tpu.memory_space<vmem>>, vector<1x8x128xf32>
    tpu.vector_store %arg5[%c0_16, %c0_17, %c128_18], %17 {strides = array<i32>} : memref<1x8x256xf32, #tpu.memory_space<vmem>>, vector<1x8x128xf32>,
    return
  }
  func.func @transform_0(%arg0: i32, %arg1: i32) -> (i32, i32, i32) {
    %c0_i32 = arith.constant 0 : i32
    %c0_i32_0 = arith.constant 0 : i32
    return %arg0, %arg1, %c0_i32 : i32, i32, i32
  }
  func.func @transform_1(%arg0: i32, %arg1: i32) -> (i32, i32, i32) {
    %c0_i32 = arith.constant 0 : i32
    %c0_i32_0 = arith.constant 0 : i32
    %c0_i32_1 = arith.constant 0 : i32
    %c0_i32_2 = arith.constant 0 : i32
    return %c0_i32, %c0_i32_0, %c0_i32_1 : i32, i32, i32
  }
  func.func @transform_2(%arg0: i32, %arg1: i32) -> (i32, i32, i32) {
    %c0_i32 = arith.constant 0 : i32
    %c0_i32_0 = arith.constant 0 : i32
    return %arg0, %arg1, %c0_i32 : i32, i32, i32
  }
  func.func @transform_3(%arg0: i32, %arg1: i32) -> (i32, i32, i32) {
    %c0_i32 = arith.constant 0 : i32
    %c0_i32_0 = arith.constant 0 : i32
    return %arg0, %arg1, %c0_i32 : i32, i32, i32
  }
}

</mosaic_0001>

<bundles_post_ra>
// kernel: gemma2_rotary_embedding.1
= control target key start
LH: loop header
LB: loop body
LE: loop exit
PB: predicated region body
PF: predicated region fallthrough
CT: control target
= control target key end

     0   :  { %9 = vsyncpa [#allocation3], 0  ;;  %s995_s0 = inlined_call_operand.vmem [shape: f32[2,8,1], index: 0, kind: input, shape index: {}]   ;;  %s996_s1 = inlined_call_operand.vmem [shape: f32[1,1,128], index: 1, kind: input, shape index: {}]   ;;  %s997_s2 = inlined_call_operand.hbm [shape: f32[2,8,256], index: 2, kind: output, shape index: {0}]   ;;  %s998_s3 = inlined_call_operand.hbm [shape: f32[2,8,256], index: 3, kind: output, shape index: {1}]  }
   0x1   :  { %11 = vsyncpa [#allocation3 + $0x1], 0 }
   0x2   :  { %12 = vsyncpa [#allocation5], 0 }
   0x3   :  { %14 = vsyncpa [#allocation5 + $0x1], 0  ;;  %s826_s12 = smov 0   ;;  %s828_s13 = smov 0  }
   0x4   :  { %s830_s14 = smov 0   ;;  %s832_s15 = smov 0  }
   0x5   :  { %s834_s16 = smov 0   ;;  %s836_s17 = smov 0  }
   0x6 LB: > { %s582_s18 = sadd.s32 4294967295, %s795_s17   ;;  %s583_s19 = sadd.s32 4294967294, %s795_s17   ;;  %s795_s17 = sphi %s836_s17, %s20_s17   ;;  %s791_s16 = sphi %s834_s16, %s1005_s16   ;;  %s787_s15 = sphi %s832_s15, %s1004_s15   ;;  %s783_s14 = sphi %s830_s14, %s1003_s14   ;;  %s779_s13 = sphi %s828_s13, %s1002_s13   ;;  %s775_s12 = sphi %s826_s12, %s1001_s12  }
   0x7   : > { %s32_s20 = sadd.s32 1, %s791_s16  ;;  %s90_s21 = sadd.s32 1, %s783_s14 }
   0x8   : > { %p34_p0 = scmp.ge.s32.totalorder %s32_s20, 2  ;;  %p100_p1 = scmp.ne.s32.totalorder %s783_s14, %s779_s13 }
   0x9   : > { %p101_p2 = scmp.eq.s32.totalorder %s582_s18, 1  ;;  %p106_p3 = scmp.ne.s32.totalorder %s779_s13, %s775_s12 }
   0xa   : > { %s1007_s20 = smov (%p34_p0, %s32_s20), 0  ;;  %p107_p5 = scmp.eq.s32.totalorder %s583_s19, 1 }
   0xb   : > { %p866_p4 = por %p101_p2, %p100_p1  ;;  %s85_s23 = ssub.s32 %s791_s16, %s1007_s20 }
   0xc   : > { %p586_p6 = scmp.ge.s32.totalorder %s795_s17, 1  ;;  %p88_p7 = scmp.eq.s32.totalorder %s85_s23, 0 }
   0xd   : > { %p873_p8 = por %p107_p5, %p106_p3  ;;  %p166_p9 = scmp.lt.s32.totalorder %s795_s17, 3 }
   0xe   : > { %s879_s25 = scalar_select %p88_p7, %s783_s14, %s90_s21  }
   0xf   : > { %p167_p10 = pnand %p586_p6, %p166_p9 }
  0x10   : > { %p197_p11 = scmp.lt.s32.totalorder (!%p167_p10), %s787_s15, 1  ;;  %v797_v0 = vmov (!%p167_p10), 0   ;;  %v590_v2 = vld [vmem:[%s996_s1] ss:$0 sm:$0xff] (!%p167_p10)  ;;  %v798_v22 = vmov (!%p167_p10), 683565275  }
  0x11   : > { %170 = sbr.rel (%p167_p10) target bundleno = 288 (0x120), region = 28  ;;  %680 = vset.pattern.permute.xlu0 (!%p167_p10), %v797_v0  ;;  %v799_v24 = vmov (!%p167_p10), 2475754826   ;;  %v800_v27 = vmov (!%p167_p10), 2131351028   ;;  %s910_s6 = sand.u32 (!%p167_p10), 1, %s779_s13  }
  0x12   : > { %v801_v30 = vmov (!%p167_p10), 2102212464   ;;  %v802_v33 = vmov (!%p167_p10), 920167782   ;;  %v803_v36 = vmov (!%p167_p10), 1326507024  }
  0x13   : > { %s587_s7 = sshll.u32 (!%p167_p10), %s910_s6, 4  ;;  %s607_s8 = sshll.u32 (!%p167_p10), %s787_s15, 8 }
  0x14   : > { %s189_s9 = scalar_lea.vmem (!%p167_p10), [#allocation2], %s587_s7  ;;  %s196_s11 = scalar_lea.vmem (!%p167_p10), [#allocation4], %s587_s7 }
  0x15   : > { %s458_s10 = sshll.u32 (!%p167_p10), %s189_s9, 4  ;;  %s474_s18 = sshll.u32 (!%p167_p10), %s196_s11, 4  ;;  %s920_s10 = int_to_ptr.vmem [resolvable:$true] %s458_s10  ;;  %s927_s18 = int_to_ptr.vmem [resolvable:$true] %s474_s18 }
  0x16   : > { %s917_s23 = scalar_lea.hbm (!%p167_p10), %s997_s2, %s607_s8  ;;  %s437_s28 = scalar_lea.sflag (!%p167_p10), [#allocation3], %s910_s6 }
  0x17   : > { %s685_s29 = scalar_lea.vmem (!%p167_p10), %s920_s10, 256 }
  0x18   : > { %s198_s26 = scalar_select %p197_p11, %s787_s15, 1 }
  0x19   : > { %p686_p12 = scmp.ne.s32.totalorder %s920_s10, %s685_s29 }
  0x1a   : > { %s589_s27 = sshll.u32 %s198_s26, 3 }
  0x1b   : > { %s203_s30 = scalar_lea.vmem %s995_s0, %s589_s27  ;;  %s925_s27 = scalar_lea.hbm %s998_s3, %s607_s8 }
  0x1c   : > { %v204_v1 = vld [vmem:[%s203_s30] sm:$0xff]  ;;  %p687_p13 = pnand %p686_p12, %p866_p4  ;;  %s804_s30 = smov [#allocation2]  }
  0x1d   : > { %208 = vperm.xlu0 %680, %v204_v1   ;;  %s689_s4 = sshll.u32 %s804_s30, 4  ;;  %s690_s4 = int_to_ptr.vmem [resolvable:$false] %s689_s4 }
  0x1e   : > { %p688_p0 = pneg %p687_p13  ;;  %s691_s5 = scalar_lea.vmem %s690_s4, 512 }
  0x1f   : > { %p692_p1 = scmp.lt.s32.totalorder %s920_s10, %s690_s4  ;;  %p693_p2 = scmp.lt.s32.totalorder %s691_s5, %s685_s29 }
  0x21   : > { %p694_p3 = por %p693_p2, %p692_p1 }
  0x23   : > { %p695_p5 = pnand %p694_p3, %p688_p0 }
  0x9c   : > { %v209_v3 = vpop.permute.xlu0 %208 }
  0x9d   : > { %v217_v4 = vmul.f32 %v590_v2, %v209_v3 }
  0x9f   : > { %v218_v5 = vmul.f32 0.15915494, %v217_v4 }
  0xa1   : > { %v219_v6 = vadd.f32 0.5, %v218_v5 }
  0xa3   : > { %v220_v7 = vfloor.f32 %v219_v6 }
  0xa5   : > { %v221_v8 = vmul.f32 6.28125, %v220_v7  ;;  %v223_v10 = vmul.f32 0.0019353072, %v220_v7 }
  0xa7   : > { %v222_v9 = vsub.f32 %v217_v4, %v221_v8 }
  0xa9   : > { %v889_v11 = vsub.f32 %v222_v9, %v223_v10 }
  0xab   : > { %v228_v12 = vand.u32 2139095040, %v889_v11  ;;  %v225_v16 = vand.u32 2147483647, %v889_v11  ;;  %vm227_vm7 = vcmp.lt.s32.totalorder %v889_v11, 0  ;;  %vm317_vm15 = vweird.f32 %v889_v11 }
  0xad   : > { %v229_v13 = vshrl.u32 %v228_v12, 23  ;;  %v232_v19 = vand.u32 8388607, %v225_v16  ;;  %vm226_vm8 = vcmp.le.f32.partialorder %v225_v16, 0.7853982 }
  0xaf   : > { %v591_v14 = vadd.s32 4294967169, %v229_v13  ;;  %v233_v38 = vor.u32 8388608, %v232_v19 }
  0xb1   : > { %v235_v15 = vadd.s32 1, %v591_v14  ;;  %v273_v52 = vshll.u32 %v233_v38, 8 }
  0xb3   : > { %vm236_vm0 = vcmp.gt.s32.totalorder %v235_v15, 0 }
  0xb4   : > { %v237_v17 = vsel %vm236_vm0, %v235_v15, 0 }
  0xb5   : > { %v239_v18 = vand.u32 31, %v237_v17  ;;  %v238_v21 = vshrl.u32 %v237_v17, 5 }
  0xb7   : > { %v240_v20 = vsub.s32 32, %v239_v18  ;;  %v242_v23 = vshll.u32 %v798_v22, %v239_v18  ;;  %v245_v25 = vshll.u32 %v799_v24, %v239_v18  ;;  %v248_v29 = vshll.u32 %v800_v27, %v239_v18 }
  0xb8   : > { %v251_v32 = vshll.u32 %v801_v30, %v239_v18  ;;  %v254_v35 = vshll.u32 %v802_v33, %v239_v18  ;;  %vm257_vm1 = vcmp.lt.s32.totalorder %v238_v21, 1  ;;  %vm260_vm2 = vcmp.lt.s32.totalorder %v238_v21, 4 }
  0xb9   : > { %v243_v26 = vshrl.u32 %v799_v24, %v240_v20  ;;  %v246_v28 = vshrl.u32 %v800_v27, %v240_v20  ;;  %v249_v31 = vshrl.u32 %v801_v30, %v240_v20  ;;  %v252_v34 = vshrl.u32 %v802_v33, %v240_v20 }
  0xba   : > { %v255_v37 = vshrl.u32 %v803_v36, %v240_v20  ;;  %v241_v47 = vshrl.u32 %v798_v22, %v240_v20  ;;  %vm259_vm3 = vcmp.lt.s32.totalorder %v238_v21, 3  ;;  %vm258_vm4 = vcmp.lt.s32.totalorder %v238_v21, 2 }
  0xbb   : > { %v244_v39 = vor.u32 %v243_v26, %v242_v23  ;;  %v247_v40 = vor.u32 %v246_v28, %v245_v25  ;;  %v250_v41 = vor.u32 %v249_v31, %v248_v29  ;;  %v253_v42 = vor.u32 %v252_v34, %v251_v32 }
  0xbc   : > { %v256_v43 = vor.u32 %v255_v37, %v254_v35 }
  0xbd   : > { %v262_v44 = vsel %vm260_vm2, %v250_v41, 2102212464  ;;  %v265_v45 = vsel %vm257_vm1, %v244_v39, %v247_v40  ;;  %v269_v46 = vsel %vm257_vm1, %v247_v40, %v250_v41  ;;  %v266_v48 = vsel %vm260_vm2, %v253_v42, 920167782 }
  0xbe   : > { %v270_v49 = vsel %vm260_vm2, %v256_v43, 1326507024  ;;  %v267_v50 = vsel %vm259_vm3, %v250_v41, %v266_v48  ;;  %v261_v53 = vsel %vm257_vm1, %v241_v47, %v244_v39  ;;  %v263_v54 = vsel %vm259_vm3, %v247_v40, %v262_v44 }
  0xbf   : > { %v271_v51 = vsel %vm259_vm3, %v253_v42, %v270_v49  ;;  %v268_v55 = vsel %vm258_vm4, %v265_v45, %v267_v50  ;;  %v264_v61 = vsel %vm258_vm4, %v261_v53, %v263_v54 }
  0xc0   : > { %v272_v56 = vsel %vm258_vm4, %v269_v46, %v271_v51  ;;  %v898_v59 = vmul.u32.u64.low %v273_v52, %v268_v55  ;;  %v899_v60 = vmul.u32.u64.high %v273_v52, %v268_v55, %v898_v59  ;;  %v280_v63 = vmul.u32 %v273_v52, %v264_v61 }
  0xc1   : > { %v895_v57 = vmul.u32.u64.low %v273_v52, %v272_v56  ;;  %v896_v58 = vmul.u32.u64.high %v273_v52, %v272_v56, %v895_v57 }
  0xc2   : > { %v283_v62 = vadd.s32 1, %v899_v60 }
  0xc3   : > { %vm282_vm5 = vc.u32 %v896_v58, %v898_v59  ;;  %v281_v12 = vadd.s32 %v898_v59, %v896_v58 }
  0xc4   : > { %v284_v0 = vsel %vm282_vm5, %v283_v62, %v899_v60 }
  0xc5   : > { %v285_v1 = vadd.s32 %v284_v0, %v280_v63 }
  0xc7   : > { %v286_v2 = vadd.s32 536870912, %v285_v1 }
  0xc9   : > { %v287_v3 = vshrl.u32 %v286_v2, 30 }
  0xcb   : > { %v288_v4 = vshll.u32 %v287_v3, 30  ;;  %v311_v25 = vsub.s32 4, %v287_v3 }
  0xcd   : > { %v289_v5 = vsub.s32 %v285_v1, %v288_v4  ;;  %v312_v28 = vsel %vm227_vm7, %v311_v25, %v287_v3 }
  0xce   : > { %v314_v30 = vsel %vm226_vm8, 0, %v312_v28 }
  0xcf   : > { %v291_v6 = vsub.s32 0, %v289_v5  ;;  %v421_v31 = vadd.s32 3, %v314_v30  ;;  %v318_v32 = vand.u32 3, %v314_v30 }
  0xd1   : > { %v592_v7 = vmin.u32 %v291_v6, %v289_v5  ;;  %v422_v33 = vand.u32 3, %v421_v31  ;;  %vm323_vm9 = vcmp.eq.s32.totalorder %v318_v32, 2  ;;  %vm320_vm11 = vcmp.eq.s32.totalorder %v318_v32, 0 }
  0xd2   : > { %vm319_vm13 = vcmp.lt.s32.totalorder %v318_v32, 2 }
  0xd3   : > { %v293_v8 = vclz %v592_v7  ;;  %vm427_vm10 = vcmp.eq.s32.totalorder %v422_v33, 2  ;;  %vm424_vm12 = vcmp.eq.s32.totalorder %v422_v33, 0  ;;  %vm423_vm14 = vcmp.lt.s32.totalorder %v422_v33, 2 }
  0xd5   : > { %v593_v9 = vadd.s32 4294967294, %v293_v8 }
  0xd7   : > { %vm594_vm6 = vcmp.lt.s32.totalorder %v593_v9, 0 }
  0xd8   : > { %v296_v10 = vsel %vm594_vm6, 0, %v593_v9 }
  0xd9   : > { %v297_v13 = vsub.s32 32, %v296_v10  ;;  %v301_v14 = vsub.s32 4294967266, %v296_v10  ;;  %v298_v15 = vshll.u32 %v289_v5, %v296_v10 }
  0xdb   : > { %v299_v17 = vshrl.u32 %v281_v12, %v297_v13  ;;  %v302_v18 = vadd.s32 127, %v301_v14 }
  0xdd   : > { %v300_v19 = vor.u32 %v299_v17, %v298_v15  ;;  %v303_v20 = vshll.u32 %v302_v18, 23 }
  0xdf   : > { %v304_v21 = vor.u32 4788187, %v303_v20  ;;  %v307_v23 = vcvt.s32.f32 %v300_v19 }
  0xe1   : > { %v305_v22 = vand.u32 2147483647, %v304_v21 }
  0xe3   : > { %v308_v24 = vmul.f32 %v307_v23, %v305_v22 }
  0xe5   : > { %v309_v26 = vxor.u32 2147483648, %v308_v24 }
  0xe7   : > { %v310_v27 = vsel %vm227_vm7, %v309_v26, %v308_v24 }
  0xe8   : > { %v313_v29 = vsel %vm226_vm8, %v889_v11, %v310_v27 }
  0xe9   : > { %681 = vcosq.f32 %v313_v29 }
  0xea   : > { %683 = vsinq.f32 %v313_v29 }
  0xf3   : > { %v682_v34 = vpop.eup %681 }
  0xf4   : > { %v684_v35 = vpop.eup %683  ;;  %v324_v36 = vxor.u32 2147483648, %v682_v34 }
  0xf5   : > { %v321_v37 = vxor.u32 2147483648, %v684_v35 }
  0xf6   : > { %v325_v16 = vsel %vm323_vm9, %v324_v36, %v684_v35  ;;  %v429_v38 = vsel %vm427_vm10, %v324_v36, %v684_v35 }
  0xf7   : > { %v322_v39 = vsel %vm320_vm11, %v682_v34, %v321_v37  ;;  %v426_v40 = vsel %vm424_vm12, %v682_v34, %v321_v37 }
  0xf8   : > { %v326_v41 = vsel %vm319_vm13, %v322_v39, %v325_v16  ;;  %v430_v42 = vsel %vm423_vm14, %v426_v40, %v429_v38 }
  0xf9   : > { %v327_v43 = vsel %vm317_vm15, nan, %v326_v41  ;;  %v431_v44 = vsel %vm317_vm15, nan, %v430_v42 }
  0xfa   : > { %432 = vst [vmem:[%s189_s9] sm:$0xff] %v327_v43  ;;  %433 = vst [vmem:[%s189_s9 + $0x8] sm:$0xff] %v327_v43 }
  0xfb   : > { %434 = vst [vmem:[%s196_s11] sm:$0xff] %v431_v44  ;;  %435 = vst [vmem:[%s196_s11 + $0x8] sm:$0xff] %v431_v44 }
  0xfc   : > { %698 = shalt.err (!%p695_p5)
}
  0xfd   : > { %s699_s7 = scalar_lea.hbm %s917_s23, 256  ;;  %s703_s11 = scalar_lea.hbm %s997_s2, 512 }
  0xfe   : > { %p700_p6 = scmp.ne.s32.totalorder %s917_s23, %s699_s7  ;;  %p704_p10 = scmp.lt.u32.totalorder %s917_s23, %s997_s2 }
  0xff   : > { %p705_p11 = scmp.lt.u32.totalorder %s703_s11, %s699_s7  ;;  %p707_p13 = scmp.lt.u32.totalorder %s699_s7, %s917_s23 }
 0x100   : > { %p701_p7 = pnand %p700_p6, %p866_p4 }
 0x101   : > { %p706_p12 = por %p705_p11, %p704_p10 }
 0x102   : > { %p702_p9 = pneg %p701_p7 }
 0x103   : > { %p708_p0 = por %p707_p13, %p706_p12 }
 0x105   : > { %p709_p1 = pnand %p708_p0, %p702_p9 }
 0x107   : > { %712 = shalt.err (!%p709_p1)
}
 0x108   : > { %613 = dma.vmem_to_hbm [thread:$0]  (%p866_p4), %s920_s10, 256, %s917_s23, %s437_s28  }
 0x109   : > { %s442_s15 = scalar_lea.sflag [#allocation5], %s910_s6  ;;  %s713_s26 = scalar_lea.vmem %s927_s18, 256 }
 0x10a   : > { %p714_p2 = scmp.ne.s32.totalorder %s927_s18, %s713_s26  ;;  %s805_s29 = smov [#allocation4]  }
 0x10b   : > { %s717_s30 = sshll.u32 %s805_s29, 4  ;;  %s718_s30 = int_to_ptr.vmem [resolvable:$false] %s717_s30 }
 0x10c   : > { %p715_p3 = pnand %p714_p2, %p866_p4  ;;  %s719_s4 = scalar_lea.vmem %s718_s30, 512 }
 0x10d   : > { %p720_p6 = scmp.lt.s32.totalorder %s927_s18, %s718_s30  ;;  %p721_p7 = scmp.lt.s32.totalorder %s719_s4, %s713_s26 }
 0x10e   : > { %p716_p5 = pneg %p715_p3 }
 0x10f   : > { %p722_p9 = por %p721_p7, %p720_p6 }
 0x111   : > { %p723_p10 = pnand %p722_p9, %p716_p5 }
 0x113   : > { %726 = shalt.err (!%p723_p10)
}
 0x114   : > { %s727_s6 = scalar_lea.hbm %s925_s27, 256  ;;  %s731_s28 = scalar_lea.hbm %s998_s3, 512 }
 0x115   : > { %p728_p11 = scmp.ne.s32.totalorder %s925_s27, %s727_s6  ;;  %p732_p0 = scmp.lt.u32.totalorder %s925_s27, %s998_s3 }
 0x116   : > { %p733_p1 = scmp.lt.u32.totalorder %s731_s28, %s727_s6  ;;  %p735_p3 = scmp.lt.u32.totalorder %s727_s6, %s925_s27 }
 0x117   : > { %p729_p12 = pnand %p728_p11, %p866_p4 }
 0x118   : > { %p734_p2 = por %p733_p1, %p732_p0 }
 0x119   : > { %p730_p13 = pneg %p729_p12 }
 0x11a   : > { %p736_p5 = por %p735_p3, %p734_p2 }
 0x11c   : > { %p737_p6 = pnand %p736_p5, %p730_p13 }
 0x11e   : > { %740 = shalt.err (!%p737_p6)
}
 0x11f   : > { %614 = dma.vmem_to_hbm [thread:$0]  (%p866_p4), %s927_s18, 256, %s925_s27, %s442_s15  }
 0x120 PF: > { %p624_p7 = scmp.ge.s32.totalorder %s795_s17, 2  ;;  %s486_s8 = sand.u32 1, %s775_s12  }
 0x121   : > { %s487_s9 = scalar_lea.sflag [#allocation3], %s486_s8 }
 0x122   : > { %p618_p9 = pnand %p624_p7, %p873_p8 }
 0x124   : > { %766 = dma.done.wait (!%p618_p9), %s487_s9, 256  }
 0x125   : > { %768 = vsyncadd (!%p618_p9), %s487_s9, 4294967040  ;;  %s496_s11 = scalar_lea.sflag [#allocation5], %s486_s8 }
 0x126   : > { %770 = dma.done.wait (!%p618_p9), %s496_s11, 256  }
 0x127   : > { %772 = vsyncadd (!%p618_p9), %s496_s11, 4294967040  ;;  %s20_s17 = sadd.s32 1, %s795_s17   ;;  %s1001_s12 = smov %s779_s13 }
 0x128   : > { %p17_p10 = scmp.ge.s32.totalorder %s20_s17, 4   ;;  %s1002_s13 = smov %s783_s14 }
 0x129   : > { %s1003_s14 = smov %s879_s25  ;;  %s1004_s15 = smov %s791_s16 }
 0x12a   : > { %s1005_s16 = smov %s1007_s20  ;;  %19 = sbr.rel (!%p17_p10) target bundleno = 6 (0x6), region = 80 }
 0x131   :  { %501 = vsyncpa [#allocation3], 1 }
 0x132   :  { %503 = vsyncpa [#allocation3 + $0x1], 1 }
 0x133   :  { %504 = vsyncpa [#allocation5], 1 }
 0x134   :  { %506 = vsyncpa [#allocation5 + $0x1], 1 }

</bundles_post_ra>
